<compile_context>
chip_gen: v6e
topology: v6e:2x2x1
jax: 0.10.0
libtpu: 0.0.40
codegen_flags: <defaults>
</compile_context>

<pallas_src>
import jax
import jax.numpy as jnp
from jax import lax
from jax.experimental import pallas as pl
from jax.experimental.pallas import tpu as pltpu

_LANE = 128
_SUBLANE = 8


def _round_up(x, m):
    return ((x + m - 1) // m) * m


def _random_policy_kernel(bits_ref, low_ref, high_ref, act_ref):
    """bits (tile_b, act_pad) u32 -> uniform action in [low, high)."""
    bits = bits_ref[...]                                   # (tile_b, act_pad) uint32

    # Mantissa trick: build a float32 in [1, 2) then subtract 1 -> U[0, 1).
    fbits = (bits >> jnp.uint32(9)) | jnp.uint32(0x3F800000)
    u01 = lax.bitcast_convert_type(fbits, jnp.float32) - 1.0

    low = low_ref[...]                                     # (1, act_pad), broadcasts
    high = high_ref[...]
    act_ref[...] = low + u01 * (high - low)

    # TODO(synk): discrete_action_space=True branch (integer sample) not
    # implemented; module default is continuous Box.
    # TODO(synk): on real TPUs the bit generation could move on-chip via
    # pltpu.prng_seed/prng_random_bits, but those lack an interpret lowering.


def random_policy_forward(state, low, high, key, num_samples=1):
    """Pallas equivalent of RandomPolicy.forward(state) for a Box action space.

    Args:
      state: (B, obs_dim) float32 -- ignored (interface parity with PyTorch).
      low:   (act_dim,) or (1, act_dim) float32 lower bounds.
      high:  (act_dim,) or (1, act_dim) float32 upper bounds.
      key:   jax PRNG key; supply a fresh key per call for fresh randomness.
      num_samples: number of i.i.d. action draws (batched in one kernel call).

    Returns:
      (num_samples, act_dim) float32 actions, uniform in [low, high).
    """
    del state  # RandomPolicy ignores the observation; do NOT DMA it.

    low = jnp.asarray(low, jnp.float32).reshape(1, -1)
    high = jnp.asarray(high, jnp.float32).reshape(1, -1)
    act_dim = low.shape[-1]

    # Pad to a lane-dense, vreg-aligned output block.
    act_pad = _round_up(act_dim, _LANE)
    b8 = _round_up(max(num_samples, 1), _SUBLANE)
    tile_b = min(b8, 128)
    b_pad = _round_up(b8, tile_b)
    grid = (b_pad // tile_b,)

    low_p = jnp.zeros((1, act_pad), jnp.float32).at[:, :act_dim].set(low)
    high_p = jnp.zeros((1, act_pad), jnp.float32).at[:, :act_dim].set(high)

    # Fresh raw bits for every call (portable; no TPU-only PRNG primitive).
    bits = jax.random.bits(key, (b_pad, act_pad), dtype=jnp.uint32)

    out = pl.pallas_call(
        _random_policy_kernel,
        out_shape=jax.ShapeDtypeStruct((b_pad, act_pad), jnp.float32),
        grid=grid,
        in_specs=[
            pl.BlockSpec((tile_b, act_pad), lambda i: (i, 0)),  # bits
            pl.BlockSpec((1, act_pad), lambda i: (0, 0)),       # low
            pl.BlockSpec((1, act_pad), lambda i: (0, 0)),       # high
        ],
        out_specs=pl.BlockSpec((tile_b, act_pad), lambda i: (i, 0)),
        compiler_params=pltpu.CompilerParams(
            dimension_semantics=("parallel",),
        ),
    )(bits, low_p, high_p)

    return out[:num_samples, :act_dim]


if __name__ == "__main__":
    key = jax.random.PRNGKey(0)
    k_state, k_act = jax.random.split(key)

    batch, obs_dim, act_dim = 2, 16, 8

    # Deterministic example inputs.
    state = jax.random.normal(k_state, (batch, obs_dim), dtype=jnp.float32)
    low = -jnp.ones((act_dim,), dtype=jnp.float32)   # Box low = -1
    high = jnp.ones((act_dim,), dtype=jnp.float32)   # Box high = +1

    # Single draw (matches RandomPolicy.forward returning one action).
    action = random_policy_forward(state, low, high, k_act)
    action = jax.block_until_ready(action)
    assert action.shape == (1, act_dim)
    assert action.dtype == jnp.float32
    assert bool(jnp.all(action >= low)) and bool(jnp.all(action <= high))

    # Batched draws: one kernel call amortizes launch overhead across samples.
    actions = random_policy_forward(
        state, low, high, jax.random.fold_in(k_act, 1), num_samples=batch)
    actions = jax.block_until_ready(actions)
    assert actions.shape == (batch, act_dim)
    assert actions.dtype == jnp.float32
    assert bool(jnp.all(actions >= low)) and bool(jnp.all(actions <= high))

    # Different keys must give different actions (fresh randomness per call).
    assert not bool(jnp.allclose(action, actions[:1]))

    print("KERNEL_OK")
</pallas_src>

<mosaic_0001>
module attributes {stable_mosaic.version = 11 : i64} {
  func.func @_random_policy_kernel(%arg0: i32, %arg1: memref<8x128xi32, #tpu.memory_space<vmem>>, %arg2: memref<1x128xf32, #tpu.memory_space<vmem>>, %arg3: memref<1x128xf32, #tpu.memory_space<vmem>>, %arg4: memref<8x128xf32, #tpu.memory_space<vmem>>) attributes {dimension_semantics = [#tpu.dimension_semantics<parallel>], iteration_bounds = array<i64: 1>, scalar_prefetch = 0 : i64, scratch_operands = 0 : i64, tpu.core_type = #tpu.core_type<tc>, window_params = [{transform_indices = @transform_0, window_bounds = array<i64: 8, 128>}, {pipeline_mode = #tpu.pipeline_mode<synchronous>, transform_indices = @transform_1, window_bounds = array<i64: 1, 128>}, {pipeline_mode = #tpu.pipeline_mode<synchronous>, transform_indices = @transform_2, window_bounds = array<i64: 1, 128>}, {transform_indices = @transform_3, window_bounds = array<i64: 8, 128>}]} {
    %c0 = arith.constant 0 : index
    %c0_0 = arith.constant 0 : index
    %0 = vector.load %arg1[%c0, %c0_0] : memref<8x128xi32, #tpu.memory_space<vmem>>, vector<8x128xi32>
    %c9_i32 = arith.constant 9 : i32
    %1 = vector.broadcast %c9_i32 : i32 to vector<8x128xi32>
    %2 = arith.shrui %0, %1 : vector<8x128xi32>
    %c1065353216_i32 = arith.constant 1065353216 : i32
    %3 = vector.broadcast %c1065353216_i32 : i32 to vector<8x128xi32>
    %4 = arith.ori %2, %3 : vector<8x128xi32>
    %5 = tpu.bitcast %4 : vector<8x128xi32> -> vector<8x128xf32>
    %cst = arith.constant 1.000000e+00 : f32
    %6 = vector.broadcast %cst : f32 to vector<8x128xf32>
    %7 = arith.subf %5, %6 : vector<8x128xf32>
    %c0_1 = arith.constant 0 : index
    %c0_2 = arith.constant 0 : index
    %8 = vector.load %arg2[%c0_1, %c0_2] : memref<1x128xf32, #tpu.memory_space<vmem>>, vector<1x128xf32>
    %c0_3 = arith.constant 0 : index
    %c0_4 = arith.constant 0 : index
    %9 = vector.load %arg3[%c0_3, %c0_4] : memref<1x128xf32, #tpu.memory_space<vmem>>, vector<1x128xf32>
    %10 = arith.subf %9, %8 : vector<1x128xf32>
    %11 = vector.broadcast %10 : vector<1x128xf32> to vector<8x128xf32>
    %12 = arith.mulf %7, %11 : vector<8x128xf32>
    %13 = vector.broadcast %8 : vector<1x128xf32> to vector<8x128xf32>
    %14 = arith.addf %13, %12 : vector<8x128xf32>
    %c0_5 = arith.constant 0 : index
    %c0_6 = arith.constant 0 : index
    %15 = vector.load %arg4[%c0_5, %c0_6] : memref<8x128xf32, #tpu.memory_space<vmem>>, vector<8x128xf32>
    tpu.vector_store %arg4[%c0_5, %c0_6], %14 {strides = array<i32>} : memref<8x128xf32, #tpu.memory_space<vmem>>, vector<8x128xf32>,
    return
  }
  func.func @transform_0(%arg0: i32) -> (i32, i32) {
    %c0_i32 = arith.constant 0 : i32
    %c0_i32_0 = arith.constant 0 : i32
    return %arg0, %c0_i32 : i32, i32
  }
  func.func @transform_1(%arg0: i32) -> (i32, i32) {
    %c0_i32 = arith.constant 0 : i32
    %c0_i32_0 = arith.constant 0 : i32
    %c0_i32_1 = arith.constant 0 : i32
    return %c0_i32, %c0_i32_0 : i32, i32
  }
  func.func @transform_2(%arg0: i32) -> (i32, i32) {
    %c0_i32 = arith.constant 0 : i32
    %c0_i32_0 = arith.constant 0 : i32
    %c0_i32_1 = arith.constant 0 : i32
    return %c0_i32, %c0_i32_0 : i32, i32
  }
  func.func @transform_3(%arg0: i32) -> (i32, i32) {
    %c0_i32 = arith.constant 0 : i32
    %c0_i32_0 = arith.constant 0 : i32
    return %arg0, %c0_i32 : i32, i32
  }
}

</mosaic_0001>

<bundles_post_ra>
// kernel: tpu_custom_call.1
= control target key start
LH: loop header
LB: loop body
LE: loop exit
PB: predicated region body
PF: predicated region fallthrough
CT: control target
= control target key end

     0   :  { %8 = vsyncpa [#allocation3], 0  ;;  %s146_s0 = inlined_call_operand.hbm [shape: u32[8,128], index: 0, kind: input, shape index: {}]   ;;  %s147_s1 = inlined_call_operand.vmem [shape: f32[1,128], index: 1, kind: input, shape index: {}]   ;;  %s148_s2 = inlined_call_operand.vmem [shape: f32[1,128], index: 2, kind: input, shape index: {}]   ;;  %s149_s3 = inlined_call_operand.hbm [shape: f32[8,128], index: 3, kind: output, shape index: {}]  }
   0x1   :  { %9 = vsyncpa [#allocation4], 0  ;;  %s112_s12 = smov [#allocation2]  }
   0x2   :  { %s16_s13 = sshll.u32 %s112_s12, 4  ;;  %s17_s13 = int_to_ptr.vmem [resolvable:$true] %s16_s13 }
   0x3   :  { %s76_s14 = scalar_lea.vmem %s17_s13, 128  ;;  %p81_p1 = scmp.lt.s32.totalorder %s17_s13, %s17_s13 }
   0x4   :  { %p77_p0 = scmp.ne.s32.totalorder %s17_s13, %s76_s14  ;;  %p82_p2 = scmp.lt.s32.totalorder %s76_s14, %s76_s14 }
   0x6   :  { %p83_p3 = por %p82_p2, %p81_p1 }
   0x8   :  { %p84_p4 = pnand %p83_p3, %p77_p0 }
   0xa   :  { %87 = shalt.err (!%p84_p4)
}
   0xb   :  { %19 = dma.hbm_to_vmem [thread:$0]  %s146_s0, 128, %s17_s13, [#allocation3]  }
   0xc   :  { %108 = dma.done.wait [#allocation3], 128  }
   0xd   :  { %109 = vsyncadd [#allocation3], 4294967168  ;;  %v36_v0 = vlaneseq  ;;  %v27_v3 = vld [vmem:[#allocation2] sm:$0xff]  ;;  %s113_s0 = smov [#allocation5]  }
   0xe   :  { %v32_v4 = vld [vmem:[%s147_s1] sm:$0x1]  ;;  %v28_v6 = vshrl.u32 %v27_v3, 9  ;;  %s56_s21 = sshll.u32 %s113_s0, 4  ;;  %s57_s21 = int_to_ptr.vmem [resolvable:$true] %s56_s21 }
   0xf   :  { %v37_v1 = vshrl.u32 %v36_v0, 7  ;;  %v33_v5 = vld [vmem:[%s148_s2] sm:$0x1]  ;;  %s88_s22 = scalar_lea.vmem %s57_s21, 128  ;;  %p93_p6 = scmp.lt.s32.totalorder %s57_s21, %s57_s21 }
  0x10   :  { %v34_v7 = vsub.f32 %v33_v5, %v32_v4  ;;  %v29_v8 = vor.u32 1065353216, %v28_v6  ;;  %p89_p5 = scmp.ne.s32.totalorder %s57_s21, %s88_s22  ;;  %p94_p7 = scmp.lt.s32.totalorder %s88_s22, %s88_s22 }
  0x11   :  { %v38_v2 = vsub.s32 0, %v37_v1 }
  0x12   :  { %v65_v10 = vadd.f32 -1.0, %v29_v8  ;;  %p95_p8 = por %p94_p7, %p93_p6 }
  0x13   :  { %v39_v9 = vrot.slane %v34_v7, %v38_v2  ;;  %v46_v11 = vrot.slane %v32_v4, %v38_v2 }
  0x14   :  { %p96_p9 = pnand %p95_p8, %p89_p5 }
  0x15   :  { %v41_v12 = vmul.f32 %v65_v10, %v39_v9 }
  0x17   :  { %v48_v13 = vadd.f32 %v46_v11, %v41_v12 }
  0x19   :  { %49 = vst [vmem:[#allocation5] sm:$0xff] %v48_v13 }
  0x1a   :  { %99 = shalt.err (!%p96_p9)
}
  0x1b   :  { %59 = dma.vmem_to_hbm [thread:$0]  %s57_s21, 128, %s149_s3, [#allocation4]  }
  0x1c   :  { %110 = dma.done.wait [#allocation4], 128  }
  0x1d   :  { %111 = vsyncadd [#allocation4], 4294967168 }
  0x1e   :  { %63 = vsyncpa [#allocation3], 1 }
  0x1f   :  { %64 = vsyncpa [#allocation4], 1 }

</bundles_post_ra>
